<compile_context>
chip_gen: v5e
topology: v5e:2x2
jax: 0.10.0
libtpu: 0.0.40
codegen_flags: <defaults>
</compile_context>

<pallas_src>
import functools

import jax
import jax.numpy as jnp
from jax import lax
from jax.experimental import pallas as pl
from jax.experimental.pallas import tpu as pltpu

EPS = 1e-5


# ------------------------------ in-kernel helpers -----------------------------

def _fill_im2col(col_ref, phases, stride):
    """Build the k=3 / pad=1 im2col slab in a VMEM scratch.

    phases[p] is a (C, B*(Lout+2)) slab with
      phases[p][:, b*(Lout+2) + 1 + l] == x[b, :, stride*l + p]
    and zeros at the two per-segment pad columns.  Rows [k*C, (k+1)*C) of
    col_ref receive tap k (i.e. x[stride*l + (k-1)]), which is phase
    (k-1) % stride shifted by m0 = (k-1 - phase)//stride lanes (m0 in
    {-1, 0, +1}); out-of-range lanes are written as zero.
    """
    c = phases[0].shape[0]
    n = col_ref.shape[-1]
    dt = col_ref.dtype
    for k in range(3):
        t = k - 1
        p = t % stride
        m0 = (t - p) // stride
        src = phases[p].astype(dt)
        rows = slice(k * c, (k + 1) * c)
        if m0 == 0:
            col_ref[rows, :] = src
        elif m0 == 1:                              # tap reads one lane ahead
            col_ref[rows, 0:n - 1] = src[:, 1:n]
            col_ref[rows, n - 1:n] = jnp.zeros((c, 1), dt)
        else:                                      # m0 == -1: one lane behind
            col_ref[rows, 1:n] = src[:, 0:n - 1]
            col_ref[rows, 0:1] = jnp.zeros((c, 1), dt)


def _bn(h, mask, gamma, beta, inv_count):
    """Training-mode BatchNorm1d on a (C, B*(Lout+2)) slab.

    One-pass masked sufficient statistics (sum, sum-of-squares) over the
    B*Lout signal columns; biased variance, eps=1e-5.
    """
    hm = h * mask
    mean = jnp.sum(hm, axis=1, keepdims=True) * inv_count
    ex2 = jnp.sum(hm * h, axis=1, keepdims=True) * inv_count
    var = jnp.maximum(ex2 - mean * mean, 0.0)
    return (h - mean) * lax.rsqrt(var + EPS) * gamma + beta


def _block_body(o_ref, col1_ref, col2_ref, xph_ref, mask_ref,
                w1_ref, g1_ref, b1_ref, w2_ref, g2_ref, b2_ref, ds_refs,
                *, stride, count, cdt):
    mask = mask_ref[...]                                   # (1, Lflat)
    inv_count = 1.0 / count

    # ---- conv1: one MXU matmul, K = 3*Cin, N = B*(Lout+2) (lane-dense) ----
    x_phases = [xph_ref[p] for p in range(stride)]
    _fill_im2col(col1_ref, x_phases, stride)
    h1 = jnp.dot(w1_ref[...].astype(cdt), col1_ref[...],
                 preferred_element_type=jnp.float32)       # (Cout, Lflat)

    # ---- bn1 + relu; re-zero pad columns so they act as conv2's zero pad ----
    h = jnp.maximum(_bn(h1, mask, g1_ref[...], b1_ref[...], inv_count), 0.0) * mask

    # ---- conv2 (stride 1): one MXU matmul, K = 3*Cout ----
    _fill_im2col(col2_ref, [h], 1)
    h2 = jnp.dot(w2_ref[...].astype(cdt), col2_ref[...],
                 preferred_element_type=jnp.float32)
    out = _bn(h2, mask, g2_ref[...], b2_ref[...], inv_count)

    # ---- shortcut ----
    if ds_refs is None:
        out = out + x_phases[0]            # identity (stride == 1, Cin == Cout)
    else:
        wds_ref, gds_ref, bds_ref = ds_refs
        ds = jnp.dot(wds_ref[...].astype(cdt), x_phases[0].astype(cdt),
                     preferred_element_type=jnp.float32)   # 1x1 strided conv
        out = out + _bn(ds, mask, gds_ref[...], bds_ref[...], inv_count)

    o_ref[...] = jnp.maximum(out, 0.0)


# --------------------------------- kernels -----------------------------------

def _kernel_identity(xph_ref, mask_ref, w1_ref, g1_ref, b1_ref,
                     w2_ref, g2_ref, b2_ref, o_ref, col1_ref, col2_ref,
                     *, stride, count, cdt):
    _block_body(o_ref, col1_ref, col2_ref, xph_ref, mask_ref,
                w1_ref, g1_ref, b1_ref, w2_ref, g2_ref, b2_ref, None,
                stride=stride, count=count, cdt=cdt)


def _kernel_downsample(xph_ref, mask_ref, w1_ref, g1_ref, b1_ref,
                       w2_ref, g2_ref, b2_ref, wds_ref, gds_ref, bds_ref,
                       o_ref, col1_ref, col2_ref, *, stride, count, cdt):
    _block_body(o_ref, col1_ref, col2_ref, xph_ref, mask_ref,
                w1_ref, g1_ref, b1_ref, w2_ref, g2_ref, b2_ref,
                (wds_ref, gds_ref, bds_ref),
                stride=stride, count=count, cdt=cdt)


# --------------------------------- wrapper -----------------------------------

def _phase_slabs(x, stride, l_out):
    """(B, C, L) -> (stride, C, B*(l_out+2)), channel-major, per-segment padded.

    slab[p, c, b*(l_out+2) + 1 + l] = x[b, c, stride*l + p]; the two columns at
    each segment edge are zero (they double as the k=3 conv's zero padding).
    """
    b, c, _ = x.shape
    xcm = jnp.transpose(x, (1, 0, 2))                      # (C, B, L)
    slabs = []
    for p in range(stride):
        ph = xcm[:, :, p::stride]                          # (C, B, n_p), n_p <= l_out
        n_p = ph.shape[-1]
        ph = jnp.pad(ph, ((0, 0), (0, 0), (1, l_out + 1 - n_p)))
        slabs.append(ph.reshape(c, b * (l_out + 2)))
    return jnp.stack(slabs, axis=0)


def _signal_mask(batch, l_out):
    col = jnp.arange(l_out + 2)
    m = ((col >= 1) & (col <= l_out)).astype(jnp.float32)
    return jnp.tile(m, (batch,)).reshape(1, batch * (l_out + 2))


def resnet_block_forward(x, params, stride, compute_dtype=jnp.float32):
    x = x.astype(jnp.float32)
    batch, c_in, length = x.shape
    c_out = params["w1"].shape[0]
    l_out = (length - 1) // stride + 1
    l_flat = batch * (l_out + 2)

    xph = _phase_slabs(x, stride, l_out)                   # (stride, Cin, Lflat)
    mask = _signal_mask(batch, l_out)                      # (1, Lflat)

    # k=3 weights as (Cout, 3*C) slabs: column k*C + ci <-> w[:, ci, k].
    w1 = jnp.transpose(params["w1"], (0, 2, 1)).reshape(c_out, 3 * c_in)
    w2 = jnp.transpose(params["w2"], (0, 2, 1)).reshape(c_out, 3 * c_out)
    g1 = params["g1"].reshape(c_out, 1)
    b1 = params["b1"].reshape(c_out, 1)
    g2 = params["g2"].reshape(c_out, 1)
    b2 = params["b2"].reshape(c_out, 1)

    vmem = pl.BlockSpec(memory_space=pltpu.MemorySpace.VMEM)
    kwargs = dict(stride=stride, count=float(batch * l_out), cdt=compute_dtype)
    # Tiny VMEM footprint here; 32 MiB is a safe explicit scoped budget on
    # v5e/v6e (128 MiB physical) and v7x (64 MiB physical).
    cparams = pltpu.CompilerParams(vmem_limit_bytes=32 * 1024 * 1024)
    out_shape = jax.ShapeDtypeStruct((c_out, l_flat), jnp.float32)
    scratch = [pltpu.VMEM((3 * c_in, l_flat), compute_dtype),
               pltpu.VMEM((3 * c_out, l_flat), compute_dtype)]

    if "wds" in params:
        wds = params["wds"][:, :, 0]                       # (Cout, Cin)
        gds = params["gds"].reshape(c_out, 1)
        bds = params["bds"].reshape(c_out, 1)
        y = pl.pallas_call(
            functools.partial(_kernel_downsample, **kwargs),
            out_shape=out_shape,
            in_specs=[vmem] * 11,
            out_specs=vmem,
            scratch_shapes=scratch,
            compiler_params=cparams,
        )(xph, mask, w1, g1, b1, w2, g2, b2, wds, gds, bds)
    else:
        y = pl.pallas_call(
            functools.partial(_kernel_identity, **kwargs),
            out_shape=out_shape,
            in_specs=[vmem] * 8,
            out_specs=vmem,
            scratch_shapes=scratch,
            compiler_params=cparams,
        )(xph, mask, w1, g1, b1, w2, g2, b2)

    # (Cout, B*(Lout+2)) -> strip per-segment pad columns -> (B, Cout, Lout).
    y = y.reshape(c_out, batch, l_out + 2)[:, :, 1:l_out + 1]
    return jnp.transpose(y, (1, 0, 2))


# ------------------------- params & pure-JAX reference -----------------------

def init_params(key, c_in, c_out, stride):
    ks = jax.random.split(key, 8)
    p = {
        "w1": 0.2 * jax.random.normal(ks[0], (c_out, c_in, 3), jnp.float32),
        "g1": 1.0 + 0.1 * jax.random.normal(ks[1], (c_out,), jnp.float32),
        "b1": 0.1 * jax.random.normal(ks[2], (c_out,), jnp.float32),
        "w2": 0.2 * jax.random.normal(ks[3], (c_out, c_out, 3), jnp.float32),
        "g2": 1.0 + 0.1 * jax.random.normal(ks[4], (c_out,), jnp.float32),
        "b2": 0.1 * jax.random.normal(ks[5], (c_out,), jnp.float32),
    }
    if stride != 1 or c_in != c_out:
        p["wds"] = 0.2 * jax.random.normal(ks[6], (c_out, c_in, 1), jnp.float32)
        p["gds"] = jnp.ones((c_out,), jnp.float32)
        p["bds"] = jnp.zeros((c_out,), jnp.float32)
    return p


def _ref_block(x, p, stride):
    dn = ("NCH", "OIH", "NCH")

    def conv(v, w, s, pad):
        return lax.conv_general_dilated(v, w, (s,), [(pad, pad)],
                                        dimension_numbers=dn)

    def bn(h, g, b):
        m = h.mean(axis=(0, 2), keepdims=True)
        v = ((h - m) ** 2).mean(axis=(0, 2), keepdims=True)
        return (h - m) * lax.rsqrt(v + EPS) * g.reshape(1, -1, 1) + b.reshape(1, -1, 1)

    out = jax.nn.relu(bn(conv(x, p["w1"], stride, 1), p["g1"], p["b1"]))
    out = bn(conv(out, p["w2"], 1, 1), p["g2"], p["b2"])
    idn = bn(conv(x, p["wds"], stride, 0), p["gds"], p["bds"]) if "wds" in p else x
    return jax.nn.relu(out + idn)


# ----------------------------------- main -------------------------------------

if __name__ == "__main__":
    key = jax.random.PRNGKey(0)
    kx, kp1, kp2 = jax.random.split(key, 3)

    # Case 1: in=4 -> out=8, stride=2 (downsample shortcut active).
    x = jax.random.normal(kx, (2, 4, 16), jnp.float32)
    p1 = init_params(kp1, 4, 8, 2)
    y1 = jax.block_until_ready(resnet_block_forward(x, p1, 2))
    r1 = _ref_block(x, p1, 2)
    assert y1.shape == (2, 8, 8), y1.shape
    assert jnp.allclose(y1, r1, atol=1e-4, rtol=1e-4), "stride-2 path mismatch"

    # Case 2: in=out=4, stride=1 (identity shortcut).
    p2 = init_params(kp2, 4, 4, 1)
    y2 = jax.block_until_ready(resnet_block_forward(x, p2, 1))
    r2 = _ref_block(x, p2, 1)
    assert y2.shape == (2, 4, 16), y2.shape
    assert jnp.allclose(y2, r2, atol=1e-4, rtol=1e-4), "identity path mismatch"

    print("KERNEL_OK")
</pallas_src>

<mosaic_0001>
module attributes {stable_mosaic.version = 11 : i64} {
  func.func @_kernel_downsample(%arg0: memref<2x4x20xf32, #tpu.memory_space<vmem>>, %arg1: memref<1x20xf32, #tpu.memory_space<vmem>>, %arg2: memref<8x12xf32, #tpu.memory_space<vmem>>, %arg3: memref<8x1xf32, #tpu.memory_space<vmem>>, %arg4: memref<8x1xf32, #tpu.memory_space<vmem>>, %arg5: memref<8x24xf32, #tpu.memory_space<vmem>>, %arg6: memref<8x1xf32, #tpu.memory_space<vmem>>, %arg7: memref<8x1xf32, #tpu.memory_space<vmem>>, %arg8: memref<8x4xf32, #tpu.memory_space<vmem>>, %arg9: memref<8x1xf32, #tpu.memory_space<vmem>>, %arg10: memref<8x1xf32, #tpu.memory_space<vmem>>, %arg11: memref<8x20xf32, #tpu.memory_space<vmem>>, %arg12: memref<12x20xf32, #tpu.memory_space<vmem>>, %arg13: memref<24x20xf32, #tpu.memory_space<vmem>>) attributes {dimension_semantics = [], scalar_prefetch = 0 : i64, scratch_operands = 2 : i64, tpu.core_type = #tpu.core_type<tc>} {
    %c0 = arith.constant 0 : index
    %c0_0 = arith.constant 0 : index
    %0 = vector.load %arg1[%c0, %c0_0] : memref<1x20xf32, #tpu.memory_space<vmem>>, vector<1x20xf32>
    %c0_1 = arith.constant 0 : index
    %c0_2 = arith.constant 0 : index
    %c0_3 = arith.constant 0 : index
    %1 = vector.load %arg0[%c0_1, %c0_2, %c0_3] : memref<2x4x20xf32, #tpu.memory_space<vmem>>, vector<1x4x20xf32>
    %2 = vector.shape_cast %1 : vector<1x4x20xf32> to vector<4x20xf32>
    %c1 = arith.constant 1 : index
    %c0_4 = arith.constant 0 : index
    %c0_5 = arith.constant 0 : index
    %3 = vector.load %arg0[%c1, %c0_4, %c0_5] : memref<2x4x20xf32, #tpu.memory_space<vmem>>, vector<1x4x20xf32>
    %4 = vector.shape_cast %3 : vector<1x4x20xf32> to vector<4x20xf32>
    %5 = vector.extract_strided_slice %4 {offsets = [0, 0], sizes = [4, 19], strides = [1, 1]} : vector<4x20xf32> to vector<4x19xf32>
    %c0_6 = arith.constant 0 : index
    %c1_7 = arith.constant 1 : index
    %6 = vector.load %arg12[%c0_6, %c1_7] : memref<12x20xf32, #tpu.memory_space<vmem>>, vector<4x19xf32>
    tpu.vector_store %arg12[%c0_6, %c1_7], %5 {strides = array<i32>} : memref<12x20xf32, #tpu.memory_space<vmem>>, vector<4x19xf32>,
    %cst = arith.constant 0.000000e+00 : f32
    %7 = vector.broadcast %cst : f32 to vector<4x1xf32>
    %c0_8 = arith.constant 0 : index
    %c0_9 = arith.constant 0 : index
    %8 = vector.load %arg12[%c0_8, %c0_9] : memref<12x20xf32, #tpu.memory_space<vmem>>, vector<4x1xf32>
    tpu.vector_store %arg12[%c0_8, %c0_9], %7 {strides = array<i32>} : memref<12x20xf32, #tpu.memory_space<vmem>>, vector<4x1xf32>,
    %c4 = arith.constant 4 : index
    %c0_10 = arith.constant 0 : index
    %9 = vector.load %arg12[%c4, %c0_10] : memref<12x20xf32, #tpu.memory_space<vmem>>, vector<4x20xf32>
    tpu.vector_store %arg12[%c4, %c0_10], %2 {strides = array<i32>} : memref<12x20xf32, #tpu.memory_space<vmem>>, vector<4x20xf32>,
    %c8 = arith.constant 8 : index
    %c0_11 = arith.constant 0 : index
    %10 = vector.load %arg12[%c8, %c0_11] : memref<12x20xf32, #tpu.memory_space<vmem>>, vector<4x20xf32>
    tpu.vector_store %arg12[%c8, %c0_11], %4 {strides = array<i32>} : memref<12x20xf32, #tpu.memory_space<vmem>>, vector<4x20xf32>,
    %c0_12 = arith.constant 0 : index
    %c0_13 = arith.constant 0 : index
    %11 = vector.load %arg2[%c0_12, %c0_13] : memref<8x12xf32, #tpu.memory_space<vmem>>, vector<8x12xf32>
    %c0_14 = arith.constant 0 : index
    %c0_15 = arith.constant 0 : index
    %12 = vector.load %arg12[%c0_14, %c0_15] : memref<12x20xf32, #tpu.memory_space<vmem>>, vector<12x20xf32>
    %cst_16 = arith.constant dense<0.000000e+00> : vector<8x20xf32>
    %13 = tpu.matmul %11, %12, %cst_16 {dimension_numbers = #tpu.dot_dimension_numbers<[1], [0], [0], [1], [0, 0, 1, 1], [], []>} : vector<8x12xf32>, vector<12x20xf32>, vector<8x20xf32> -> vector<8x20xf32>
    %c0_17 = arith.constant 0 : index
    %c0_18 = arith.constant 0 : index
    %14 = vector.load %arg3[%c0_17, %c0_18] : memref<8x1xf32, #tpu.memory_space<vmem>>, vector<8x1xf32>
    %c0_19 = arith.constant 0 : index
    %c0_20 = arith.constant 0 : index
    %15 = vector.load %arg4[%c0_19, %c0_20] : memref<8x1xf32, #tpu.memory_space<vmem>>, vector<8x1xf32>
    %16 = vector.broadcast %0 : vector<1x20xf32> to vector<8x20xf32>
    %17 = arith.mulf %13, %16 : vector<8x20xf32>
    %cst_21 = arith.constant dense<0.000000e+00> : vector<8xf32>
    %18 = vector.multi_reduction <add>, %17, %cst_21 [1] : vector<8x20xf32> to vector<8xf32>
    %19 = vector.shape_cast %18 : vector<8xf32> to vector<8x1xf32>
    %cst_22 = arith.constant 6.250000e-02 : f32
    %20 = vector.broadcast %cst_22 : f32 to vector<8x1xf32>
    %21 = arith.mulf %19, %20 : vector<8x1xf32>
    %22 = arith.mulf %17, %13 : vector<8x20xf32>
    %cst_23 = arith.constant dense<0.000000e+00> : vector<8xf32>
    %23 = vector.multi_reduction <add>, %22, %cst_23 [1] : vector<8x20xf32> to vector<8xf32>
    %24 = vector.shape_cast %23 : vector<8xf32> to vector<8x1xf32>
    %cst_24 = arith.constant 6.250000e-02 : f32
    %25 = vector.broadcast %cst_24 : f32 to vector<8x1xf32>
    %26 = arith.mulf %24, %25 : vector<8x1xf32>
    %27 = arith.mulf %21, %21 : vector<8x1xf32>
    %28 = arith.subf %26, %27 : vector<8x1xf32>
    %cst_25 = arith.constant 0.000000e+00 : f32
    %29 = vector.broadcast %cst_25 : f32 to vector<8x1xf32>
    %30 = arith.maximumf %28, %29 : vector<8x1xf32>
    %31 = vector.broadcast %21 : vector<8x1xf32> to vector<8x20xf32>
    %32 = arith.subf %13, %31 : vector<8x20xf32>
    %cst_26 = arith.constant 9.99999974E-6 : f32
    %33 = vector.broadcast %cst_26 : f32 to vector<8x1xf32>
    %34 = arith.addf %30, %33 : vector<8x1xf32>
    %35 = math.rsqrt %34 : vector<8x1xf32>
    %36 = vector.broadcast %35 : vector<8x1xf32> to vector<8x20xf32>
    %37 = arith.mulf %32, %36 : vector<8x20xf32>
    %38 = vector.broadcast %14 : vector<8x1xf32> to vector<8x20xf32>
    %39 = arith.mulf %37, %38 : vector<8x20xf32>
    %40 = vector.broadcast %15 : vector<8x1xf32> to vector<8x20xf32>
    %41 = arith.addf %39, %40 : vector<8x20xf32>
    %cst_27 = arith.constant 0.000000e+00 : f32
    %42 = vector.broadcast %cst_27 : f32 to vector<8x20xf32>
    %43 = arith.maximumf %41, %42 : vector<8x20xf32>
    %44 = vector.broadcast %0 : vector<1x20xf32> to vector<8x20xf32>
    %45 = arith.mulf %43, %44 : vector<8x20xf32>
    %46 = vector.extract_strided_slice %45 {offsets = [0, 0], sizes = [8, 19], strides = [1, 1]} : vector<8x20xf32> to vector<8x19xf32>
    %c0_28 = arith.constant 0 : index
    %c1_29 = arith.constant 1 : index
    %47 = vector.load %arg13[%c0_28, %c1_29] : memref<24x20xf32, #tpu.memory_space<vmem>>, vector<8x19xf32>
    tpu.vector_store %arg13[%c0_28, %c1_29], %46 {strides = array<i32>} : memref<24x20xf32, #tpu.memory_space<vmem>>, vector<8x19xf32>,
    %cst_30 = arith.constant 0.000000e+00 : f32
    %48 = vector.broadcast %cst_30 : f32 to vector<8x1xf32>
    %c0_31 = arith.constant 0 : index
    %c0_32 = arith.constant 0 : index
    %49 = vector.load %arg13[%c0_31, %c0_32] : memref<24x20xf32, #tpu.memory_space<vmem>>, vector<8x1xf32>
    tpu.vector_store %arg13[%c0_31, %c0_32], %48 {strides = array<i32>} : memref<24x20xf32, #tpu.memory_space<vmem>>, vector<8x1xf32>,
    %c8_33 = arith.constant 8 : index
    %c0_34 = arith.constant 0 : index
    %50 = vector.load %arg13[%c8_33, %c0_34] : memref<24x20xf32, #tpu.memory_space<vmem>>, vector<8x20xf32>
    tpu.vector_store %arg13[%c8_33, %c0_34], %45 {strides = array<i32>} : memref<24x20xf32, #tpu.memory_space<vmem>>, vector<8x20xf32>,
    %51 = vector.extract_strided_slice %45 {offsets = [0, 1], sizes = [8, 19], strides = [1, 1]} : vector<8x20xf32> to vector<8x19xf32>
    %c16 = arith.constant 16 : index
    %c0_35 = arith.constant 0 : index
    %52 = vector.load %arg13[%c16, %c0_35] : memref<24x20xf32, #tpu.memory_space<vmem>>, vector<8x19xf32>
    tpu.vector_store %arg13[%c16, %c0_35], %51 {strides = array<i32>} : memref<24x20xf32, #tpu.memory_space<vmem>>, vector<8x19xf32>,
    %cst_36 = arith.constant 0.000000e+00 : f32
    %53 = vector.broadcast %cst_36 : f32 to vector<8x1xf32>
    %c16_37 = arith.constant 16 : index
    %c19 = arith.constant 19 : index
    %54 = vector.load %arg13[%c16_37, %c19] : memref<24x20xf32, #tpu.memory_space<vmem>>, vector<8x1xf32>
    tpu.vector_store %arg13[%c16_37, %c19], %53 {strides = array<i32>} : memref<24x20xf32, #tpu.memory_space<vmem>>, vector<8x1xf32>,
    %c0_38 = arith.constant 0 : index
    %c0_39 = arith.constant 0 : index
    %55 = vector.load %arg5[%c0_38, %c0_39] : memref<8x24xf32, #tpu.memory_space<vmem>>, vector<8x24xf32>
    %c0_40 = arith.constant 0 : index
    %c0_41 = arith.constant 0 : index
    %56 = vector.load %arg13[%c0_40, %c0_41] : memref<24x20xf32, #tpu.memory_space<vmem>>, vector<24x20xf32>
    %cst_42 = arith.constant dense<0.000000e+00> : vector<8x20xf32>
    %57 = tpu.matmul %55, %56, %cst_42 {dimension_numbers = #tpu.dot_dimension_numbers<[1], [0], [0], [1], [0, 0, 1, 1], [], []>} : vector<8x24xf32>, vector<24x20xf32>, vector<8x20xf32> -> vector<8x20xf32>
    %c0_43 = arith.constant 0 : index
    %c0_44 = arith.constant 0 : index
    %58 = vector.load %arg6[%c0_43, %c0_44] : memref<8x1xf32, #tpu.memory_space<vmem>>, vector<8x1xf32>
    %c0_45 = arith.constant 0 : index
    %c0_46 = arith.constant 0 : index
    %59 = vector.load %arg7[%c0_45, %c0_46] : memref<8x1xf32, #tpu.memory_space<vmem>>, vector<8x1xf32>
    %60 = vector.broadcast %0 : vector<1x20xf32> to vector<8x20xf32>
    %61 = arith.mulf %57, %60 : vector<8x20xf32>
    %cst_47 = arith.constant dense<0.000000e+00> : vector<8xf32>
    %62 = vector.multi_reduction <add>, %61, %cst_47 [1] : vector<8x20xf32> to vector<8xf32>
    %63 = vector.shape_cast %62 : vector<8xf32> to vector<8x1xf32>
    %cst_48 = arith.constant 6.250000e-02 : f32
    %64 = vector.broadcast %cst_48 : f32 to vector<8x1xf32>
    %65 = arith.mulf %63, %64 : vector<8x1xf32>
    %66 = arith.mulf %61, %57 : vector<8x20xf32>
    %cst_49 = arith.constant dense<0.000000e+00> : vector<8xf32>
    %67 = vector.multi_reduction <add>, %66, %cst_49 [1] : vector<8x20xf32> to vector<8xf32>
    %68 = vector.shape_cast %67 : vector<8xf32> to vector<8x1xf32>
    %cst_50 = arith.constant 6.250000e-02 : f32
    %69 = vector.broadcast %cst_50 : f32 to vector<8x1xf32>
    %70 = arith.mulf %68, %69 : vector<8x1xf32>
    %71 = arith.mulf %65, %65 : vector<8x1xf32>
    %72 = arith.subf %70, %71 : vector<8x1xf32>
    %cst_51 = arith.constant 0.000000e+00 : f32
    %73 = vector.broadcast %cst_51 : f32 to vector<8x1xf32>
    %74 = arith.maximumf %72, %73 : vector<8x1xf32>
    %75 = vector.broadcast %65 : vector<8x1xf32> to vector<8x20xf32>
    %76 = arith.subf %57, %75 : vector<8x20xf32>
    %cst_52 = arith.constant 9.99999974E-6 : f32
    %77 = vector.broadcast %cst_52 : f32 to vector<8x1xf32>
    %78 = arith.addf %74, %77 : vector<8x1xf32>
    %79 = math.rsqrt %78 : vector<8x1xf32>
    %80 = vector.broadcast %79 : vector<8x1xf32> to vector<8x20xf32>
    %81 = arith.mulf %76, %80 : vector<8x20xf32>
    %82 = vector.broadcast %58 : vector<8x1xf32> to vector<8x20xf32>
    %83 = arith.mulf %81, %82 : vector<8x20xf32>
    %84 = vector.broadcast %59 : vector<8x1xf32> to vector<8x20xf32>
    %85 = arith.addf %83, %84 : vector<8x20xf32>
    %c0_53 = arith.constant 0 : index
    %c0_54 = arith.constant 0 : index
    %86 = vector.load %arg8[%c0_53, %c0_54] : memref<8x4xf32, #tpu.memory_space<vmem>>, vector<8x4xf32>
    %cst_55 = arith.constant dense<0.000000e+00> : vector<8x20xf32>
    %87 = tpu.matmul %86, %2, %cst_55 {dimension_numbers = #tpu.dot_dimension_numbers<[1], [0], [0], [1], [0, 0, 1, 1], [], []>} : vector<8x4xf32>, vector<4x20xf32>, vector<8x20xf32> -> vector<8x20xf32>
    %c0_56 = arith.constant 0 : index
    %c0_57 = arith.constant 0 : index
    %88 = vector.load %arg9[%c0_56, %c0_57] : memref<8x1xf32, #tpu.memory_space<vmem>>, vector<8x1xf32>
    %c0_58 = arith.constant 0 : index
    %c0_59 = arith.constant 0 : index
    %89 = vector.load %arg10[%c0_58, %c0_59] : memref<8x1xf32, #tpu.memory_space<vmem>>, vector<8x1xf32>
    %90 = vector.broadcast %0 : vector<1x20xf32> to vector<8x20xf32>
    %91 = arith.mulf %87, %90 : vector<8x20xf32>
    %cst_60 = arith.constant dense<0.000000e+00> : vector<8xf32>
    %92 = vector.multi_reduction <add>, %91, %cst_60 [1] : vector<8x20xf32> to vector<8xf32>
    %93 = vector.shape_cast %92 : vector<8xf32> to vector<8x1xf32>
    %cst_61 = arith.constant 6.250000e-02 : f32
    %94 = vector.broadcast %cst_61 : f32 to vector<8x1xf32>
    %95 = arith.mulf %93, %94 : vector<8x1xf32>
    %96 = arith.mulf %91, %87 : vector<8x20xf32>
    %cst_62 = arith.constant dense<0.000000e+00> : vector<8xf32>
    %97 = vector.multi_reduction <add>, %96, %cst_62 [1] : vector<8x20xf32> to vector<8xf32>
    %98 = vector.shape_cast %97 : vector<8xf32> to vector<8x1xf32>
    %cst_63 = arith.constant 6.250000e-02 : f32
    %99 = vector.broadcast %cst_63 : f32 to vector<8x1xf32>
    %100 = arith.mulf %98, %99 : vector<8x1xf32>
    %101 = arith.mulf %95, %95 : vector<8x1xf32>
    %102 = arith.subf %100, %101 : vector<8x1xf32>
    %cst_64 = arith.constant 0.000000e+00 : f32
    %103 = vector.broadcast %cst_64 : f32 to vector<8x1xf32>
    %104 = arith.maximumf %102, %103 : vector<8x1xf32>
    %105 = vector.broadcast %95 : vector<8x1xf32> to vector<8x20xf32>
    %106 = arith.subf %87, %105 : vector<8x20xf32>
    %cst_65 = arith.constant 9.99999974E-6 : f32
    %107 = vector.broadcast %cst_65 : f32 to vector<8x1xf32>
    %108 = arith.addf %104, %107 : vector<8x1xf32>
    %109 = math.rsqrt %108 : vector<8x1xf32>
    %110 = vector.broadcast %109 : vector<8x1xf32> to vector<8x20xf32>
    %111 = arith.mulf %106, %110 : vector<8x20xf32>
    %112 = vector.broadcast %88 : vector<8x1xf32> to vector<8x20xf32>
    %113 = arith.mulf %111, %112 : vector<8x20xf32>
    %114 = vector.broadcast %89 : vector<8x1xf32> to vector<8x20xf32>
    %115 = arith.addf %113, %114 : vector<8x20xf32>
    %116 = arith.addf %85, %115 : vector<8x20xf32>
    %cst_66 = arith.constant 0.000000e+00 : f32
    %117 = vector.broadcast %cst_66 : f32 to vector<8x20xf32>
    %118 = arith.maximumf %116, %117 : vector<8x20xf32>
    %c0_67 = arith.constant 0 : index
    %c0_68 = arith.constant 0 : index
    %119 = vector.load %arg11[%c0_67, %c0_68] : memref<8x20xf32, #tpu.memory_space<vmem>>, vector<8x20xf32>
    tpu.vector_store %arg11[%c0_67, %c0_68], %118 {strides = array<i32>} : memref<8x20xf32, #tpu.memory_space<vmem>>, vector<8x20xf32>,
    return
  }
}

</mosaic_0001>

<bundles_post_ra>
// kernel: tpu_custom_call.1
= control target key start
LH: loop header
LB: loop body
LE: loop exit
PB: predicated region body
PF: predicated region fallthrough
CT: control target
= control target key end

     0   :  { %vm51_vm0 = vcmask 158720   ;;  %s349_s21 = smov 1   ;;  %s477_s0 = inlined_call_operand.vmem [shape: f32[2,4,20], index: 0, kind: input, shape index: {}]   ;;  %s478_s1 = inlined_call_operand.vmem [shape: f32[1,20], index: 1, kind: input, shape index: {}]   ;;  %s479_s2 = inlined_call_operand.vmem [shape: f32[8,12], index: 2, kind: input, shape index: {}]   ;;  %s480_s3 = inlined_call_operand.vmem [shape: f32[8,1], index: 3, kind: input, shape index: {}]   ;;  %s481_s4 = inlined_call_operand.vmem [shape: f32[8,1], index: 4, kind: input, shape index: {}]   ;;  %s482_s5 = inlined_call_operand.vmem [shape: f32[8,24], index: 5, kind: input, shape index: {}]   ;;  %s483_s6 = inlined_call_operand.vmem [shape: f32[8,1], index: 6, kind: input, shape index: {}]   ;;  %s484_s7 = inlined_call_operand.vmem [shape: f32[8,1], index: 7, kind: input, shape index: {}]   ;;  %s485_s8 = inlined_call_operand.vmem [shape: f32[8,4], index: 8, kind: input, shape index: {}]   ;;  %s486_s9 = inlined_call_operand.vmem [shape: f32[8,1], index: 9, kind: input, shape index: {}]   ;;  %s487_s10 = inlined_call_operand.vmem [shape: f32[8,1], index: 10, kind: input, shape index: {}]   ;;  %s488_s11 = inlined_call_operand.hbm [shape: f32[8,20], index: 11, kind: output, shape index: {}]  }
   0x1   :  { %v302_v0 = vld [vmem:[%s477_s0 + $0x4] sm:$0xf]  ;;  %v40_v1 = vld [vmem:[%s477_s0] sm:$0xf] }
   0x2   :  { %44 = vrot.lane.b32.xlu0 %v302_v0, %s349_s21  ;;  %52 = vst.msk [vmem:[#allocation2 + $0x4] sm:$0xf] %vm51_vm0, %v40_v1 }
   0x3   :  { %53 = vst.msk [vmem:[#allocation2 + $0x8] sm:$0xf] %vm51_vm0, %v302_v0 }
   0x4   :  { %16 = vsyncpa [#allocation5], 0  ;;  %vm61_vm1 = vcmask 1043456   ;;  %v215_v3 = vld [vmem:[%s485_s8] sm:$0xff]  ;;  %vm216_vm2 = vcmask 31744   ;;  %vm47_vm3 = vcmask 158728  }
   0x5   :  { %306 = vmatpush.msk.msra.mxu2 %vm61_vm1, %v40_v1  ;;  %vm49_vm4 = vcmask 3072   ;;  %v350_v5 = vmov 0.0   ;;  %v54_v6 = vld [vmem:[%s479_s2] sm:$0xff]  ;;  %vm57_vm5 = vcmask 97280   ;;  %v351_v8 = vmov 0   ;;  %s293_s17 = sshll.u32 %s488_s11, 4  ;;  %s294_s17 = int_to_ptr.hbm [resolvable:$true] %s293_s17 }
   0x6   :  { %307 = vmatmul.msk.f32.vlgmr.msra.gmra.mxu2 %vm216_vm2, %v215_v3  ;;  %313 = vset.pattern.permute.xlu1 %v351_v8  ;;  %v431_v9 = vld [vmem:[%s478_s1] ss:$0 sm:$0xff]  ;;  %vm91_vm6 = vcmask 162816   ;;  %vm143_vm10 = vcmask 154624   ;;  %vm145_vm11 = vcmask 162968   ;;  %vm135_vm12 = vcmask 162824  }
   0x7   :  { %314 = vset.pattern.permute.xlu2 %v351_v8  ;;  %315 = vset.pattern.permute.xlu0 %v351_v8  ;;  %v86_v10 = vld [vmem:[%s481_s4] sm:$0xff]  ;;  %vm137_vm13 = vcmask 7168   ;;  %vm151_vm14 = vcmask 195584  }
   0x8   :  { %125 = vperm.xlu2 %314, %v86_v10   ;;  %v85_v16 = vld [vmem:[%s480_s3] sm:$0xff]  ;;  %s352_s3 = smov 127  }
   0x9   :  { %v176_v20 = vld [vmem:[%s484_s7] sm:$0xff] }
   0xa   :  { %v56_v2 = vld [vmem:[#allocation2 + $0x8] sm:$0xf]  ;;  %v175_v44 = vld [vmem:[%s483_s6] sm:$0xff] }
   0xb   :  { %303 = vmatpush.msk.msra.mxu0 %vm61_vm1, %v56_v2  ;;  %v147_v51 = vld [vmem:[%s482_s5] sm:$0xff] }
   0xc   :  { %v243_v58 = vld [vmem:[%s486_s9] sm:$0xff]  ;;  %s353_s9 = smov [#allocation4]  }
   0xd   :  { %v244_v59 = vld [vmem:[%s487_s10] sm:$0xff]  ;;  %s291_s10 = sshll.u32 %s353_s9, 4  ;;  %s292_s10 = int_to_ptr.vmem [resolvable:$true] %s291_s10 }
  0x62   :  { %v126_v39 = vpop.permute.xlu2 %125 }
  0x74   :  { %v45_v4 = vpop.permute.xlu0 %44 }
  0x75   :  { %48 = vst.msk [vmem:[#allocation2] sm:$0xf] %vm47_vm3, %v45_v4 }
  0x76   :  { %50 = vst.msk [vmem:[#allocation2] sm:$0xf] %vm49_vm4, %v350_v5 }
  0x7d   :  { %v55_v7 = vld [vmem:[#allocation2] sm:$0xff] }
  0x7e   :  { %80 = vmatpush.msra.mxu0 %v55_v7 }
  0x7f   :  { %304 = vmatmul.msk.f32.vlgmr.msra.gmra.mxu0 %vm57_vm5, %v54_v6 }
  0x89   :  { %v442_v17 = vpop.f32.mrf.mxu2 }
  0x8a   :  { %v245_v18 = vmul.f32 %v431_v9, %v442_v17 }
  0x8c   :  { %v246_v19 = vsel %vm91_vm6, %v245_v18, 0.0  ;;  %v250_v45 = vmul.f32 %v245_v18, %v442_v17 }
  0x8e   :  { %v251_v46 = vsel %vm91_vm6, %v250_v45, 0.0 }
  0xfc   :  { %v82_v11 = vpop.f32.mrf.mxu0 }
  0xfd   :  { %v90_v12 = vmul.f32 %v431_v9, %v82_v11 }
  0xff   :  { %v92_v13 = vsel %vm91_vm6, %v90_v12, 0.0  ;;  %v96_v14 = vmul.f32 %v90_v12, %v82_v11 }
 0x100   :  { %93 = vadd.xlane.f32.xlu0 %v92_v13 }
 0x101   :  { %v97_v15 = vsel %vm91_vm6, %v96_v14, 0.0 }
 0x102   :  { %98 = vadd.xlane.f32.xlu1 %v97_v15 }
 0x108   :  { %252 = vadd.xlane.f32.xlu0 %v251_v46 }
 0x11b   :  { %119 = vperm.xlu1 %313, %v85_v16  }
 0x145   :  { %247 = vadd.xlane.f32.xlu1 %v246_v19 }
 0x15e   :  { %211 = vperm.xlu1 %313, %v176_v20  }
 0x173   :  { %v94_v21 = vpop.xlane.xlu0 %93 }
 0x174   :  { %v95_v22 = vmul.f32 0.0625, %v94_v21 }
 0x175   :  { %v99_v23 = vpop.xlane.xlu1 %98 }
 0x176   :  { %v101_v24 = vmul.f32 %v95_v22, %v95_v22  ;;  %v100_v25 = vmul.f32 0.0625, %v99_v23  ;;  %v104_v35 = vsub.f32 %v82_v11, %v95_v22 }
 0x178   :  { %v102_v26 = vsub.f32 %v100_v25, %v101_v24 }
 0x17a   :  { %v103_v27 = vmax.f32 %v102_v26, 0.0 }
 0x17b   :  { %v253_v62 = vpop.xlane.xlu0 %252 }
 0x17c   :  { %v105_v28 = vadd.f32 1e-05, %v103_v27  ;;  %v254_v0 = vmul.f32 0.0625, %v253_v62 }
 0x17e   :  { %317 = vrsqrt.f32 %v105_v28  ;;  %vm112_vm8 = vweird.f32 %v105_v28 }
 0x184   :  { %v318_v29 = vpop.eup %317 }
 0x185   :  { %v107_v30 = vmul.f32 %v318_v29, %v105_v28  ;;  %vm113_vm7 = vweird.f32 %v318_v29 }
 0x186   :  { %vm114_vm9 = vmor %vm112_vm8, %vm113_vm7 }
 0x187   :  { %v108_v31 = vmul.f32 %v318_v29, %v107_v30 }
 0x189   :  { %v109_v32 = vmul.f32 0.5, %v108_v31 }
 0x18b   :  { %v110_v33 = vsub.f32 1.5, %v109_v32 }
 0x18d   :  { %v111_v34 = vmul.f32 %v318_v29, %v110_v33  ;;  %v120_v36 = vpop.permute.xlu1 %119 }
 0x18f   :  { %v115_v37 = vsel %vm114_vm9, %v318_v29, %v111_v34 }
 0x190   :  { %v116_v38 = vmul.f32 %v115_v37, %v104_v35 }
 0x192   :  { %v122_v40 = vmul.f32 %v120_v36, %v116_v38 }
 0x194   :  { %v128_v41 = vadd.f32 %v126_v39, %v122_v40 }
 0x196   :  { %v129_v42 = vmax.f32 %v128_v41, 0.0 }
 0x198   :  { %v130_v43 = vmul.f32 %v431_v9, %v129_v42 }
 0x19a   :  { %139 = vst.msk [vmem:[#allocation3 + $0x8] sm:$0xff] %vm91_vm6, %v130_v43  ;;  %140 = vrot.lane.b32.xlu2 %v130_v43, %s352_s3 }
 0x1a1   :  { %v149_v50 = vld [vmem:[#allocation3 + $0x8] sm:$0xff] }
 0x1a2   :  { %132 = vrot.lane.b32.xlu2 %v130_v43, %s349_s21 }
 0x1aa   :  { %205 = vperm.xlu2 %314, %v175_v44  }
 0x1b8   :  { %v248_v60 = vpop.xlane.xlu1 %247 }
 0x1b9   :  { %v249_v61 = vmul.f32 0.0625, %v248_v60 }
 0x1bb   :  { %v255_v63 = vmul.f32 %v249_v61, %v249_v61  ;;  %v258_v24 = vsub.f32 %v442_v17, %v249_v61 }
 0x1bd   :  { %v256_v1 = vsub.f32 %v254_v0, %v255_v63 }
 0x1bf   :  { %v257_v2 = vmax.f32 %v256_v1, 0.0 }
 0x1c1   :  { %v259_v3 = vadd.f32 1e-05, %v257_v2 }
 0x1c3   :  { %319 = vrsqrt.f32 %v259_v3  ;;  %vm266_vm15 = vweird.f32 %v259_v3 }
 0x1c9   :  { %v320_v6 = vpop.eup %319 }
 0x1ca   :  { %v261_v11 = vmul.f32 %v320_v6, %v259_v3  ;;  %vm267_vm0 = vweird.f32 %v320_v6 }
 0x1cb   :  { %vm268_vm1 = vmor %vm266_vm15, %vm267_vm0 }
 0x1cc   :  { %v262_v14 = vmul.f32 %v320_v6, %v261_v11 }
 0x1ce   :  { %v263_v16 = vmul.f32 0.5, %v262_v14 }
 0x1d0   :  { %v264_v18 = vsub.f32 1.5, %v263_v16  ;;  %v212_v35 = vpop.permute.xlu1 %211 }
 0x1d2   :  { %v265_v22 = vmul.f32 %v320_v6, %v264_v18 }
 0x1d4   :  { %v269_v26 = vsel %vm268_vm1, %v320_v6, %v265_v22 }
 0x1d5   :  { %v270_v30 = vmul.f32 %v269_v26, %v258_v24 }
 0x1f4   :  { %v141_v47 = vpop.permute.xlu2 %140 }
 0x1f5   :  { %144 = vst.msk [vmem:[#allocation3 + $0x10] sm:$0xff] %vm143_vm10, %v141_v47 }
 0x1f6   :  { %146 = vst.msk [vmem:[#allocation3 + $0x10] sm:$0xff] %vm145_vm11, %v350_v5 }
 0x1fc   :  { %v133_v48 = vpop.permute.xlu2 %132 }
 0x1fd   :  { %136 = vst.msk [vmem:[#allocation3] sm:$0xff] %vm135_vm12, %v133_v48  ;;  %v150_v49 = vld [vmem:[#allocation3 + $0x10] sm:$0xff] }
 0x1fe   :  { %138 = vst.msk [vmem:[#allocation3] sm:$0xff] %vm137_vm13, %v350_v5  ;;  %168 = vmatpush.msra.mxu1 %v150_v49 }
 0x200   :  { %169 = vmatpush.msra.mxu1 %v149_v50 }
 0x204   :  { %v206_v4 = vpop.permute.xlu2 %205 }
 0x205   :  { %v148_v52 = vld [vmem:[#allocation3] sm:$0xff] }
 0x206   :  { %170 = vmatpush.msra.mxu1 %v148_v52 }
 0x207   :  { %305 = vmatmul.msk.f32.vlgmr.msra.gmra.mxu1 %vm151_vm14, %v147_v51 }
 0x284   :  { %v172_v53 = vpop.f32.mrf.mxu1 }
 0x285   :  { %v177_v54 = vmul.f32 %v431_v9, %v172_v53 }
 0x287   :  { %v182_v55 = vmul.f32 %v177_v54, %v172_v53  ;;  %v178_v56 = vsel %vm91_vm6, %v177_v54, 0.0 }
 0x288   :  { %179 = vadd.xlane.f32.xlu2 %v178_v56 }
 0x289   :  { %v183_v57 = vsel %vm91_vm6, %v182_v55, 0.0 }
 0x28a   :  { %184 = vadd.xlane.f32.xlu0 %v183_v57 }
 0x29e   :  { %273 = vperm.xlu0 %315, %v243_v58  }
 0x2a0   :  { %279 = vperm.xlu2 %314, %v244_v59  }
 0x2fb   :  { %v180_v5 = vpop.xlane.xlu2 %179 }
 0x2fc   :  { %v181_v7 = vmul.f32 0.0625, %v180_v5 }
 0x2fd   :  { %v185_v8 = vpop.xlane.xlu0 %184 }
 0x2fe   :  { %v187_v9 = vmul.f32 %v181_v7, %v181_v7  ;;  %v186_v10 = vmul.f32 0.0625, %v185_v8  ;;  %v190_v29 = vsub.f32 %v172_v53, %v181_v7 }
 0x300   :  { %v188_v12 = vsub.f32 %v186_v10, %v187_v9 }
 0x302   :  { %v189_v13 = vmax.f32 %v188_v12, 0.0 }
 0x303   :  { %v280_v36 = vpop.permute.xlu2 %279 }
 0x304   :  { %v191_v15 = vadd.f32 1e-05, %v189_v13 }
 0x306   :  { %321 = vrsqrt.f32 %v191_v15  ;;  %vm198_vm3 = vweird.f32 %v191_v15 }
 0x30c   :  { %v322_v19 = vpop.eup %321 }
 0x30d   :  { %v193_v20 = vmul.f32 %v322_v19, %v191_v15  ;;  %vm199_vm2 = vweird.f32 %v322_v19 }
 0x30e   :  { %vm200_vm4 = vmor %vm198_vm3, %vm199_vm2 }
 0x30f   :  { %v194_v21 = vmul.f32 %v322_v19, %v193_v20 }
 0x310   :  { %v274_v28 = vpop.permute.xlu0 %273 }
 0x311   :  { %v195_v23 = vmul.f32 0.5, %v194_v21  ;;  %v276_v33 = vmul.f32 %v274_v28, %v270_v30 }
 0x313   :  { %v196_v25 = vsub.f32 1.5, %v195_v23  ;;  %v282_v38 = vadd.f32 %v280_v36, %v276_v33 }
 0x315   :  { %v197_v27 = vmul.f32 %v322_v19, %v196_v25 }
 0x317   :  { %v201_v31 = vsel %vm200_vm4, %v322_v19, %v197_v27 }
 0x318   :  { %v202_v32 = vmul.f32 %v201_v31, %v190_v29 }
 0x31a   :  { %v208_v34 = vmul.f32 %v206_v4, %v202_v32 }
 0x31c   :  { %v214_v37 = vadd.f32 %v212_v35, %v208_v34 }
 0x31e   :  { %v283_v17 = vadd.f32 %v282_v38, %v214_v37 }
 0x320   :  { %v284_v39 = vmax.f32 %v283_v17, 0.0 }
 0x322   :  { %285 = vst.msk [vmem:[#allocation4] sm:$0xff] %vm91_vm6, %v284_v39 }
 0x323   :  { %296 = dma.vmem_to_hbm [thread:$0]  %s292_s10, 128, %s294_s17, [#allocation5]  }
 0x324   :  { %347 = dma.done.wait [#allocation5], 128  }
 0x325   :  { %348 = vsyncadd [#allocation5], 4294967168 }
 0x326   :  { %301 = vsyncpa [#allocation5], 1 }

</bundles_post_ra>
